<compile_context>
chip_gen: v5e
topology: v5e:2x2
jax: 0.10.0
libtpu: 0.0.40
codegen_flags: <defaults>
</compile_context>

<pallas_src>
import functools

import jax
import jax.numpy as jnp
from jax.experimental import pallas as pl
from jax.experimental.pallas import tpu as pltpu


# ----------------------------- kernels -----------------------------------------------


def _bn_fused_kernel(x_ref, w_ref, b_ref, y_ref, mean_ref, var_ref, *, eps):
    """Single-sweep BN: x_ref is (N, cc, HW); stats over axes (0, 2); centered variance."""
    x = x_ref[...].astype(jnp.float32)
    inv_m = 1.0 / float(x.shape[0] * x.shape[2])
    # Decomposed reductions: lane-axis first (XLU), then the major axis.
    mean = jnp.sum(jnp.sum(x, axis=2, keepdims=True), axis=0, keepdims=True) * inv_m
    xc = x - mean                                                    # (N, cc, HW)
    var = jnp.sum(jnp.sum(xc * xc, axis=2, keepdims=True), axis=0, keepdims=True) * inv_m
    inv = jax.lax.rsqrt(var + eps)                                   # EUP rsqrt, (1, cc, 1)
    scale = inv * w_ref[...].astype(jnp.float32)[None]               # fold gamma into scale
    shift = b_ref[...].astype(jnp.float32)[None]
    y_ref[...] = (xc * scale + shift).astype(y_ref.dtype)
    mean_ref[...] = mean[0]                                          # (cc, 1)
    var_ref[...] = var[0]


def _bn_stats_kernel(x_ref, sum_ref, sumsq_ref):
    """Pass 1 (tiled M): accumulate per-channel sum / sum-of-squares in f32."""
    m = pl.program_id(1)

    @pl.when(m == 0)
    def _():
        sum_ref[...] = jnp.zeros_like(sum_ref)
        sumsq_ref[...] = jnp.zeros_like(sumsq_ref)

    x = x_ref[...].astype(jnp.float32)                               # (N, cc, hw)
    sum_ref[...] += jnp.sum(jnp.sum(x, axis=2, keepdims=True), axis=0)       # (cc, 1)
    sumsq_ref[...] += jnp.sum(jnp.sum(x * x, axis=2, keepdims=True), axis=0)  # (cc, 1)


def _bn_apply_kernel(x_ref, scale_ref, shift_ref, y_ref):
    """Pass 2 (tiled M): streaming per-channel affine y = x*scale + shift."""
    x = x_ref[...].astype(jnp.float32)
    scale = scale_ref[...].astype(jnp.float32)[None]                 # (1, cc, 1)
    shift = shift_ref[...].astype(jnp.float32)[None]
    y_ref[...] = (x * scale + shift).astype(y_ref.dtype)


# ----------------------------- tiling / VMEM planning --------------------------------


def _vmem_limits():
    """(budget for live pipelined blocks, vmem_limit_bytes) sized per chip generation."""
    cap = 64 << 20  # conservative default = v7x physical VMEM
    try:
        info = pltpu.get_tpu_info()
        cap = int(getattr(info, "vmem_capacity_bytes", cap))
    except Exception:
        pass
    limit = min((cap * 3) // 4, 100 << 20)   # v7x: 48 MiB; v5e/v6e: 96/100 MiB
    budget = (limit * 3) // 5                # headroom for temps + compiler scratch
    return budget, limit


def _plan(N, C, HW, itemsize, budget):
    """Pick ('fused'|'tiled', cc, hw) respecting (8,128)-style layout constraints."""
    sub = {4: 8, 2: 16, 1: 32}.get(itemsize, 8)
    if C % sub == 0:
        cc_cands = sorted([m for m in range(sub, C + 1, sub) if C % m == 0], reverse=True)
    else:
        cc_cands = [C]  # ragged channel count: full-C block (legal; second-to-last == full dim)
    hw_cands = sorted([m for m in range(128, HW + 1, 128) if HW % m == 0], reverse=True)
    if not hw_cands:
        hw_cands = [HW]  # HW < 128 or ragged: full-HW blocks (legal)

    def blk(cc, hw):
        return N * cc * hw * itemsize

    # Prefer the fused single sweep (one HBM read of x) when the double-buffered x+y
    # blocks plus in-kernel temporaries fit comfortably.
    for cc in cc_cands:
        if 6 * blk(cc, HW) <= budget:
            return "fused", cc, HW

    # Otherwise tile H*W; size so double-buffered x+y (4 live blocks) fit the budget.
    best = None
    for cc in cc_cands:
        for hw in hw_cands:
            if 4 * blk(cc, hw) <= budget and (best is None or blk(cc, hw) > blk(*best)):
                best = (cc, hw)
    if best is None:
        best = (min(cc_cands), min(hw_cands))  # smallest legal tiles
    return "tiled", best[0], best[1]


# ----------------------------- wrapper ------------------------------------------------


def meta_batchnorm2d_forward(x, weight, bias, running_mean, running_var, *,
                             momentum=0.1, eps=1e-5, update_batch_stats=True,
                             vmem_budget_bytes=None):
    """Training-mode forward of MetaBatchNorm2d.

    Matches F.batch_norm(x, rm, rv, weight, bias, training=True, momentum, eps):
    normalization uses batch statistics; running stats receive the momentum update with
    the *unbiased* batch variance. Returns (y, new_running_mean, new_running_var).
    """
    N, C, H, W = x.shape
    HW = H * W
    M = N * HW
    itemsize = jnp.dtype(x.dtype).itemsize

    budget, vmem_limit = _vmem_limits()
    if vmem_budget_bytes is not None:
        budget = int(vmem_budget_bytes)

    mode, cc, hw = _plan(N, C, HW, itemsize, budget)
    gc = C // cc

    # Free, contiguous view (no transpose): kernels see (N, C, H*W).
    x3 = x.reshape(N, C, HW)
    w_col = weight.astype(jnp.float32).reshape(C, 1)
    b_col = bias.astype(jnp.float32).reshape(C, 1)

    if mode == "fused":
        kernel = functools.partial(_bn_fused_kernel, eps=float(eps))
        y3, bmean, bvar = pl.pallas_call(
            kernel,
            out_shape=(jax.ShapeDtypeStruct((N, C, HW), x.dtype),
                       jax.ShapeDtypeStruct((C, 1), jnp.float32),
                       jax.ShapeDtypeStruct((C, 1), jnp.float32)),
            grid_spec=pltpu.PrefetchScalarGridSpec(
                num_scalar_prefetch=0,
                grid=(gc,),
                in_specs=[pl.BlockSpec((N, cc, HW), lambda i: (0, i, 0)),
                          pl.BlockSpec((cc, 1), lambda i: (i, 0)),
                          pl.BlockSpec((cc, 1), lambda i: (i, 0))],
                out_specs=[pl.BlockSpec((N, cc, HW), lambda i: (0, i, 0)),
                           pl.BlockSpec((cc, 1), lambda i: (i, 0)),
                           pl.BlockSpec((cc, 1), lambda i: (i, 0))]),
            compiler_params=pltpu.CompilerParams(
                dimension_semantics=("parallel",),
                vmem_limit_bytes=vmem_limit),
            cost_estimate=pl.CostEstimate(
                flops=int(5 * N * C * HW), transcendentals=int(C),
                bytes_accessed=int(2 * N * C * HW * itemsize)),
        )(x3, w_col, b_col)
        bmean = bmean.reshape(C)
        bvar = bvar.reshape(C)
    else:
        gm = HW // hw
        # Pass 1: per-channel sum / sum-of-squares accumulated over the 'arbitrary' M axis.
        bsum, bsumsq = pl.pallas_call(
            _bn_stats_kernel,
            out_shape=(jax.ShapeDtypeStruct((C, 1), jnp.float32),
                       jax.ShapeDtypeStruct((C, 1), jnp.float32)),
            grid_spec=pltpu.PrefetchScalarGridSpec(
                num_scalar_prefetch=0,
                grid=(gc, gm),
                in_specs=[pl.BlockSpec((N, cc, hw), lambda i, m: (0, i, m))],
                out_specs=[pl.BlockSpec((cc, 1), lambda i, m: (i, 0)),
                           pl.BlockSpec((cc, 1), lambda i, m: (i, 0))]),
            compiler_params=pltpu.CompilerParams(
                dimension_semantics=("parallel", "arbitrary"),
                vmem_limit_bytes=vmem_limit),
            cost_estimate=pl.CostEstimate(
                flops=int(3 * N * C * HW), transcendentals=0,
                bytes_accessed=int(N * C * HW * itemsize)),
        )(x3)
        bmean = bsum.reshape(C) / float(M)
        # E[x^2]-mean^2 with f32 accumulation (required for single-read tiled stats);
        # clamp tiny negatives from cancellation.
        bvar = jnp.maximum(bsumsq.reshape(C) / float(M) - bmean * bmean, 0.0)
        # Fold eps / gamma / mean into per-channel scale & shift (tiny, done in XLA).
        inv = jax.lax.rsqrt(bvar + float(eps))
        scale = (inv * weight.astype(jnp.float32)).reshape(C, 1)
        shift = (bias.astype(jnp.float32) - bmean * inv * weight.astype(jnp.float32)).reshape(C, 1)
        # Pass 2: streaming normalize + affine.
        y3 = pl.pallas_call(
            _bn_apply_kernel,
            out_shape=jax.ShapeDtypeStruct((N, C, HW), x.dtype),
            grid_spec=pltpu.PrefetchScalarGridSpec(
                num_scalar_prefetch=0,
                grid=(gc, gm),
                in_specs=[pl.BlockSpec((N, cc, hw), lambda i, m: (0, i, m)),
                          pl.BlockSpec((cc, 1), lambda i, m: (i, 0)),
                          pl.BlockSpec((cc, 1), lambda i, m: (i, 0))],
                out_specs=pl.BlockSpec((N, cc, hw), lambda i, m: (0, i, m))),
            compiler_params=pltpu.CompilerParams(
                dimension_semantics=("parallel", "parallel"),
                vmem_limit_bytes=vmem_limit),
            cost_estimate=pl.CostEstimate(
                flops=int(2 * N * C * HW), transcendentals=0,
                bytes_accessed=int(2 * N * C * HW * itemsize)),
        )(x3, scale, shift)

    y = y3.reshape(N, C, H, W)

    if update_batch_stats:
        bessel = float(M) / float(M - 1) if M > 1 else 1.0
        new_rm = (1.0 - momentum) * running_mean + momentum * bmean
        new_rv = (1.0 - momentum) * running_var + momentum * (bvar * bessel)
    else:
        new_rm, new_rv = running_mean, running_var
    return y, new_rm, new_rv


# ----------------------------- reference + demo ---------------------------------------


def _reference(x, weight, bias, running_mean, running_var, momentum, eps):
    mean = jnp.mean(x, axis=(0, 2, 3))
    var = jnp.var(x, axis=(0, 2, 3))          # biased, used for normalization
    n = x.shape[0] * x.shape[2] * x.shape[3]
    var_unb = var * n / (n - 1)
    xm = mean.reshape(1, -1, 1, 1)
    xv = var.reshape(1, -1, 1, 1)
    y = (x - xm) / jnp.sqrt(xv + eps) * weight.reshape(1, -1, 1, 1) + bias.reshape(1, -1, 1, 1)
    new_rm = (1.0 - momentum) * running_mean + momentum * mean
    new_rv = (1.0 - momentum) * running_var + momentum * var_unb
    return y, new_rm, new_rv


def _check(name, got, ref, atol=1e-4, rtol=1e-4):
    assert jnp.allclose(got, ref, atol=atol, rtol=rtol), f"{name} mismatch"


if __name__ == "__main__":
    key = jax.random.PRNGKey(0)
    k1, k2, k3, k4, k5 = jax.random.split(key, 5)

    # Case 1: spec-sized input -> fused single-block path (N=2, C=4, H=W=16).
    N, C, H, W = 2, 4, 16, 16
    x = jax.random.normal(k1, (N, C, H, W), dtype=jnp.float32)
    weight = 1.0 + 0.1 * jax.random.normal(k2, (C,), dtype=jnp.float32)
    bias = 0.1 * jax.random.normal(k3, (C,), dtype=jnp.float32)
    rm = jnp.zeros((C,), jnp.float32)
    rv = jnp.ones((C,), jnp.float32)
    y, nrm, nrv = meta_batchnorm2d_forward(x, weight, bias, rm, rv)
    y = jax.block_until_ready(y)
    y_ref, rm_ref, rv_ref = _reference(x, weight, bias, rm, rv, 0.1, 1e-5)
    assert y.shape == x.shape
    _check("case1 y", y, y_ref)
    _check("case1 running_mean", nrm, rm_ref, atol=1e-5, rtol=1e-5)
    _check("case1 running_var", nrv, rv_ref)

    # Case 2: fused path with a channel grid (cc=8, gc=2) forced by a small VMEM budget.
    N2, C2, H2, W2 = 2, 16, 8, 8
    x2 = jax.random.normal(k4, (N2, C2, H2, W2), dtype=jnp.float32)
    w2 = jnp.ones((C2,), jnp.float32)
    b2 = jnp.zeros((C2,), jnp.float32)
    rm2 = jnp.zeros((C2,), jnp.float32)
    rv2 = jnp.ones((C2,), jnp.float32)
    y2, nrm2, nrv2 = meta_batchnorm2d_forward(x2, w2, b2, rm2, rv2, vmem_budget_bytes=30_000)
    y2 = jax.block_until_ready(y2)
    y2_ref, rm2_ref, rv2_ref = _reference(x2, w2, b2, rm2, rv2, 0.1, 1e-5)
    _check("case2 y", y2, y2_ref)
    _check("case2 running_mean", nrm2, rm2_ref, atol=1e-5, rtol=1e-5)
    _check("case2 running_var", nrv2, rv2_ref)

    # Case 3: tiled two-pass path (sum/sumsq accumulation over the M axis + apply sweep)
    # forced by a tiny VMEM budget: N=2, C=16, H=W=32 -> hw tile 128, 8 M-steps.
    N3, C3, H3, W3 = 2, 16, 32, 32
    x3 = 0.5 + jax.random.normal(k5, (N3, C3, H3, W3), dtype=jnp.float32)
    w3 = 1.0 + 0.05 * jnp.arange(C3, dtype=jnp.float32)
    b3 = 0.01 * jnp.arange(C3, dtype=jnp.float32)
    rm3 = jnp.zeros((C3,), jnp.float32)
    rv3 = jnp.ones((C3,), jnp.float32)
    y3, nrm3, nrv3 = meta_batchnorm2d_forward(x3, w3, b3, rm3, rv3, vmem_budget_bytes=65_536)
    y3 = jax.block_until_ready(y3)
    y3_ref, rm3_ref, rv3_ref = _reference(x3, w3, b3, rm3, rv3, 0.1, 1e-5)
    _check("case3 y", y3, y3_ref)
    _check("case3 running_mean", nrm3, rm3_ref, atol=1e-5, rtol=1e-5)
    _check("case3 running_var", nrv3, rv3_ref)

    print("KERNEL_OK")
</pallas_src>

<mosaic_0001>
module attributes {stable_mosaic.version = 11 : i64} {
  func.func @_bn_fused_kernel(%arg0: i32, %arg1: memref<2x4x256xf32, #tpu.memory_space<vmem>>, %arg2: memref<4x1xf32, #tpu.memory_space<vmem>>, %arg3: memref<4x1xf32, #tpu.memory_space<vmem>>, %arg4: memref<2x4x256xf32, #tpu.memory_space<vmem>>, %arg5: memref<4x1xf32, #tpu.memory_space<vmem>>, %arg6: memref<4x1xf32, #tpu.memory_space<vmem>>) attributes {dimension_semantics = [#tpu.dimension_semantics<parallel>], iteration_bounds = array<i64: 1>, scalar_prefetch = 0 : i64, scratch_operands = 0 : i64, tpu.core_type = #tpu.core_type<tc>, window_params = [{transform_indices = @transform_0, window_bounds = array<i64: 2, 4, 256>}, {transform_indices = @transform_1, window_bounds = array<i64: 4, 1>}, {transform_indices = @transform_2, window_bounds = array<i64: 4, 1>}, {transform_indices = @transform_3, window_bounds = array<i64: 2, 4, 256>}, {transform_indices = @transform_4, window_bounds = array<i64: 4, 1>}, {transform_indices = @transform_5, window_bounds = array<i64: 4, 1>}]} {
    %c0 = arith.constant 0 : index
    %c0_0 = arith.constant 0 : index
    %c0_1 = arith.constant 0 : index
    %0 = vector.load %arg1[%c0, %c0_0, %c0_1] : memref<2x4x256xf32, #tpu.memory_space<vmem>>, vector<2x4x256xf32>
    %cst = arith.constant dense<0.000000e+00> : vector<2x4xf32>
    %1 = vector.multi_reduction <add>, %0, %cst [2] : vector<2x4x256xf32> to vector<2x4xf32>
    %2 = vector.shape_cast %1 : vector<2x4xf32> to vector<2x4x1xf32>
    %cst_2 = arith.constant dense<0.000000e+00> : vector<4x1xf32>
    %3 = vector.multi_reduction <add>, %2, %cst_2 [0] : vector<2x4x1xf32> to vector<4x1xf32>
    %4 = vector.shape_cast %3 : vector<4x1xf32> to vector<1x4x1xf32>
    %cst_3 = arith.constant 0.001953125 : f32
    %5 = vector.broadcast %cst_3 : f32 to vector<1x4x1xf32>
    %6 = arith.mulf %4, %5 : vector<1x4x1xf32>
    %7 = vector.broadcast %6 : vector<1x4x1xf32> to vector<2x4x256xf32>
    %8 = arith.subf %0, %7 : vector<2x4x256xf32>
    %9 = arith.mulf %8, %8 : vector<2x4x256xf32>
    %cst_4 = arith.constant dense<0.000000e+00> : vector<2x4xf32>
    %10 = vector.multi_reduction <add>, %9, %cst_4 [2] : vector<2x4x256xf32> to vector<2x4xf32>
    %11 = vector.shape_cast %10 : vector<2x4xf32> to vector<2x4x1xf32>
    %cst_5 = arith.constant dense<0.000000e+00> : vector<4x1xf32>
    %12 = vector.multi_reduction <add>, %11, %cst_5 [0] : vector<2x4x1xf32> to vector<4x1xf32>
    %13 = vector.shape_cast %12 : vector<4x1xf32> to vector<1x4x1xf32>
    %cst_6 = arith.constant 0.001953125 : f32
    %14 = vector.broadcast %cst_6 : f32 to vector<1x4x1xf32>
    %15 = arith.mulf %13, %14 : vector<1x4x1xf32>
    %cst_7 = arith.constant 9.99999974E-6 : f32
    %16 = vector.broadcast %cst_7 : f32 to vector<1x4x1xf32>
    %17 = arith.addf %15, %16 : vector<1x4x1xf32>
    %18 = math.rsqrt %17 : vector<1x4x1xf32>
    %c0_8 = arith.constant 0 : index
    %c0_9 = arith.constant 0 : index
    %19 = vector.load %arg2[%c0_8, %c0_9] : memref<4x1xf32, #tpu.memory_space<vmem>>, vector<4x1xf32>
    %20 = vector.shape_cast %19 : vector<4x1xf32> to vector<1x4x1xf32>
    %21 = arith.mulf %18, %20 : vector<1x4x1xf32>
    %c0_10 = arith.constant 0 : index
    %c0_11 = arith.constant 0 : index
    %22 = vector.load %arg3[%c0_10, %c0_11] : memref<4x1xf32, #tpu.memory_space<vmem>>, vector<4x1xf32>
    %23 = vector.shape_cast %22 : vector<4x1xf32> to vector<1x4x1xf32>
    %24 = vector.broadcast %21 : vector<1x4x1xf32> to vector<2x4x256xf32>
    %25 = arith.mulf %8, %24 : vector<2x4x256xf32>
    %26 = vector.broadcast %23 : vector<1x4x1xf32> to vector<2x4x256xf32>
    %27 = arith.addf %25, %26 : vector<2x4x256xf32>
    %c0_12 = arith.constant 0 : index
    %c0_13 = arith.constant 0 : index
    %c0_14 = arith.constant 0 : index
    %28 = vector.load %arg4[%c0_12, %c0_13, %c0_14] : memref<2x4x256xf32, #tpu.memory_space<vmem>>, vector<2x4x256xf32>
    tpu.vector_store %arg4[%c0_12, %c0_13, %c0_14], %27 {strides = array<i32>} : memref<2x4x256xf32, #tpu.memory_space<vmem>>, vector<2x4x256xf32>,
    %29 = vector.shape_cast %6 : vector<1x4x1xf32> to vector<4x1xf32>
    %c0_15 = arith.constant 0 : index
    %c0_16 = arith.constant 0 : index
    %30 = vector.load %arg5[%c0_15, %c0_16] : memref<4x1xf32, #tpu.memory_space<vmem>>, vector<4x1xf32>
    tpu.vector_store %arg5[%c0_15, %c0_16], %29 {strides = array<i32>} : memref<4x1xf32, #tpu.memory_space<vmem>>, vector<4x1xf32>,
    %31 = vector.shape_cast %15 : vector<1x4x1xf32> to vector<4x1xf32>
    %c0_17 = arith.constant 0 : index
    %c0_18 = arith.constant 0 : index
    %32 = vector.load %arg6[%c0_17, %c0_18] : memref<4x1xf32, #tpu.memory_space<vmem>>, vector<4x1xf32>
    tpu.vector_store %arg6[%c0_17, %c0_18], %31 {strides = array<i32>} : memref<4x1xf32, #tpu.memory_space<vmem>>, vector<4x1xf32>,
    return
  }
  func.func @transform_0(%arg0: i32) -> (i32, i32, i32) {
    %c0_i32 = arith.constant 0 : i32
    %c0_i32_0 = arith.constant 0 : i32
    %c0_i32_1 = arith.constant 0 : i32
    return %c0_i32, %arg0, %c0_i32_0 : i32, i32, i32
  }
  func.func @transform_1(%arg0: i32) -> (i32, i32) {
    %c0_i32 = arith.constant 0 : i32
    %c0_i32_0 = arith.constant 0 : i32
    return %arg0, %c0_i32 : i32, i32
  }
  func.func @transform_2(%arg0: i32) -> (i32, i32) {
    %c0_i32 = arith.constant 0 : i32
    %c0_i32_0 = arith.constant 0 : i32
    return %arg0, %c0_i32 : i32, i32
  }
  func.func @transform_3(%arg0: i32) -> (i32, i32, i32) {
    %c0_i32 = arith.constant 0 : i32
    %c0_i32_0 = arith.constant 0 : i32
    %c0_i32_1 = arith.constant 0 : i32
    return %c0_i32, %arg0, %c0_i32_0 : i32, i32, i32
  }
  func.func @transform_4(%arg0: i32) -> (i32, i32) {
    %c0_i32 = arith.constant 0 : i32
    %c0_i32_0 = arith.constant 0 : i32
    return %arg0, %c0_i32 : i32, i32
  }
  func.func @transform_5(%arg0: i32) -> (i32, i32) {
    %c0_i32 = arith.constant 0 : i32
    %c0_i32_0 = arith.constant 0 : i32
    return %arg0, %c0_i32 : i32, i32
  }
}

</mosaic_0001>

<bundles_post_ra>
// kernel: tpu_custom_call.1
= control target key start
LH: loop header
LB: loop body
LE: loop exit
PB: predicated region body
PF: predicated region fallthrough
CT: control target
= control target key end

     0   :  { %11 = vsyncpa [#allocation3], 0  ;;  %s305_s0 = inlined_call_operand.hbm [shape: f32[2,4,256], index: 0, kind: input, shape index: {}]   ;;  %s306_s1 = inlined_call_operand.vmem [shape: f32[4,1], index: 1, kind: input, shape index: {}]   ;;  %s307_s2 = inlined_call_operand.vmem [shape: f32[4,1], index: 2, kind: input, shape index: {}]   ;;  %s308_s3 = inlined_call_operand.hbm [shape: f32[2,4,256], index: 3, kind: output, shape index: {0}]   ;;  %s309_s4 = inlined_call_operand.vmem [shape: f32[4,1], index: 4, kind: output, shape index: {1}]   ;;  %s310_s5 = inlined_call_operand.vmem [shape: f32[4,1], index: 5, kind: output, shape index: {2}]  }
   0x1   :  { %12 = vsyncpa [#allocation4], 0  ;;  %s17_s20 = sshll.u32 %s305_s0, 4  ;;  %s231_s21 = smov [#allocation2]   ;;  %s18_s20 = int_to_ptr.hbm [resolvable:$true] %s17_s20 }
   0x2   :  { %s19_s22 = sshll.u32 %s231_s21, 4  ;;  %s232_s23 = smov 128   ;;  %s20_s22 = int_to_ptr.vmem [resolvable:$true] %s19_s22 }
   0x3   :  { %s233_s24 = smov 8  }
   0x4   :  { %25 = dma.hbm_to_vmem [thread:$0]  %s18_s20, 256, %s20_s22, [#allocation3], %s232_s23, %s232_s23, %s233_s24  }
   0x5   :  { %227 = dma.done.wait [#allocation3], 256  }
   0x6   :  { %228 = vsyncadd [#allocation3], 4294967040  ;;  %v34_v0 = vld [vmem:[#allocation2] sm:$0xff]  ;;  %v35_v1 = vld [vmem:[#allocation2 + $0x8] sm:$0xff]  ;;  %vm49_vm0 = vcmask 1043456   ;;  %vm139_vm1 = vcmask 3072  }
   0x7   :  { %38 = vst [vmem:[#allocation1] ss:$2 sm:$0xff] %v34_v0  ;;  %v234_v13 = vmov 839922192   ;;  %v235_v36 = vmov 0  }
   0x8   :  { %42 = vst [vmem:[#allocation1 + $0x10] ss:$2 sm:$0xff] %v35_v1  ;;  %v66_v14 = vunpack.c.l.s4 %v234_v13  ;;  %175 = vset.pattern.permute.xlu2 %v235_v36  ;;  %176 = vset.pattern.permute.xlu0 %v235_v36  ;;  %v112_v50 = vld [vmem:[%s306_s1] sm:$0xf]  ;;  %s148_s1 = sshll.u32 %s308_s3, 4  ;;  %s149_s1 = int_to_ptr.hbm [resolvable:$true] %s148_s1 }
   0x9   :  { %v114_v53 = vld [vmem:[%s307_s2] sm:$0xf] }
   0xa   :  { %v67_v18 = vunpack.c.0.s8 %v66_v14 }
   0xe   :  { %v39_v2 = vld.sshfl [vmem:[#allocation1] sm:$0xff pattern:$0x75316420]  ;;  %v40_v3 = vld.sshfl [vmem:[#allocation1 + $0x8] sm:$0xff pattern:$0x75316420] }
   0xf   :  { %v50_v4 = vsel %vm49_vm0, %v39_v2, 0.0  ;;  %v51_v5 = vsel %vm49_vm0, %v40_v3, 0.0  ;;  %v43_v7 = vld.sshfl [vmem:[#allocation1 + $0x10] sm:$0xff pattern:$0x75316420] }
  0x10   :  { %v52_v6 = vadd.f32 %v51_v5, %v50_v4  ;;  %v44_v8 = vld.sshfl [vmem:[#allocation1 + $0x18] sm:$0xff pattern:$0x75316420]  ;;  %v55_v9 = vsel %vm49_vm0, %v43_v7, 0.0 }
  0x11   :  { %v56_v10 = vsel %vm49_vm0, %v44_v8, 0.0 }
  0x12   :  { %53 = vadd.xlane.f32.xlu0 %v52_v6  ;;  %v57_v11 = vadd.f32 %v56_v10, %v55_v9 }
  0x1a   :  { %58 = vadd.xlane.f32.xlu0 %v57_v11 }
  0x85   :  { %v54_v12 = vpop.xlane.xlu0 %53 }
  0x86   :  { %v60_v16 = vsel %vm49_vm0, %v54_v12, 0.0 }
  0x8d   :  { %v59_v15 = vpop.xlane.xlu0 %58 }
  0x8e   :  { %v61_v17 = vsel %vm49_vm0, %v59_v15, 0.0 }
  0x8f   :  { %v62_v19 = vadd.f32 %v61_v17, %v60_v16 }
  0x91   :  { %v63_v20 = vmul.f32 0.001953125, %v62_v19 }
  0x93   :  { %v68_v21 = vperm.slane %v63_v20, %v67_v18  ;;  %140 = vst.msk [vmem:[%s309_s4] sm:$0xf] %vm139_vm1, %v63_v20 }
  0x95   :  { %v70_v22 = vsub.f32 %v34_v0, %v68_v21  ;;  %v71_v23 = vsub.f32 %v35_v1, %v68_v21 }
  0x97   :  { %v72_v24 = vmul.f32 %v70_v22, %v70_v22  ;;  %v73_v25 = vmul.f32 %v71_v23, %v71_v23 }
  0x99   :  { %76 = vst [vmem:[#allocation1] ss:$2 sm:$0xff] %v72_v24 }
  0x9a   :  { %80 = vst [vmem:[#allocation1 + $0x10] ss:$2 sm:$0xff] %v73_v25 }
  0xa0   :  { %v77_v26 = vld.sshfl [vmem:[#allocation1] sm:$0xff pattern:$0x75316420]  ;;  %v78_v27 = vld.sshfl [vmem:[#allocation1 + $0x8] sm:$0xff pattern:$0x75316420] }
  0xa1   :  { %v87_v28 = vsel %vm49_vm0, %v77_v26, 0.0  ;;  %v88_v29 = vsel %vm49_vm0, %v78_v27, 0.0  ;;  %v81_v31 = vld.sshfl [vmem:[#allocation1 + $0x10] sm:$0xff pattern:$0x75316420] }
  0xa2   :  { %v89_v30 = vadd.f32 %v88_v29, %v87_v28  ;;  %v82_v32 = vld.sshfl [vmem:[#allocation1 + $0x18] sm:$0xff pattern:$0x75316420]  ;;  %v92_v33 = vsel %vm49_vm0, %v81_v31, 0.0 }
  0xa3   :  { %v93_v34 = vsel %vm49_vm0, %v82_v32, 0.0 }
  0xa4   :  { %90 = vadd.xlane.f32.xlu1 %v89_v30  ;;  %v94_v35 = vadd.f32 %v93_v34, %v92_v33 }
  0xac   :  { %95 = vadd.xlane.f32.xlu1 %v94_v35 }
 0x117   :  { %v91_v37 = vpop.xlane.xlu1 %90 }
 0x118   :  { %v97_v39 = vsel %vm49_vm0, %v91_v37, 0.0 }
 0x11f   :  { %v96_v38 = vpop.xlane.xlu1 %95 }
 0x120   :  { %v98_v40 = vsel %vm49_vm0, %v96_v38, 0.0 }
 0x121   :  { %v99_v41 = vadd.f32 %v98_v40, %v97_v39 }
 0x123   :  { %v100_v42 = vmul.f32 0.001953125, %v99_v41 }
 0x125   :  { %v101_v43 = vadd.f32 1e-05, %v100_v42  ;;  %141 = vst.msk [vmem:[%s310_s5] sm:$0xf] %vm139_vm1, %v100_v42  ;;  %s236_s5 = smov [#allocation5]  }
 0x126   :  { %s146_s6 = sshll.u32 %s236_s5, 4  ;;  %s147_s6 = int_to_ptr.vmem [resolvable:$true] %s146_s6 }
 0x127   :  { %177 = vrsqrt.f32 %v101_v43  ;;  %vm108_vm3 = vweird.f32 %v101_v43 }
 0x12d   :  { %v178_v44 = vpop.eup %177 }
 0x12e   :  { %v103_v45 = vmul.f32 %v178_v44, %v101_v43  ;;  %vm109_vm2 = vweird.f32 %v178_v44 }
 0x12f   :  { %vm110_vm4 = vmor %vm108_vm3, %vm109_vm2 }
 0x130   :  { %v104_v46 = vmul.f32 %v178_v44, %v103_v45 }
 0x132   :  { %v105_v47 = vmul.f32 0.5, %v104_v46 }
 0x134   :  { %v106_v48 = vsub.f32 1.5, %v105_v47 }
 0x136   :  { %v107_v49 = vmul.f32 %v178_v44, %v106_v48 }
 0x138   :  { %v111_v51 = vsel %vm110_vm4, %v178_v44, %v107_v49 }
 0x139   :  { %v113_v52 = vmul.f32 %v112_v50, %v111_v51 }
 0x13b   :  { %117 = vperm.xlu2 %175, %v113_v52  }
 0x143   :  { %128 = vperm.xlu2 %175, %v114_v53  }
 0x195   :  { %v118_v54 = vpop.permute.xlu2 %117 }
 0x196   :  { %v122_v55 = vperm.slane %v118_v54, %v67_v18 }
 0x198   :  { %v124_v57 = vmul.f32 %v122_v55, %v70_v22  ;;  %v125_v58 = vmul.f32 %v122_v55, %v71_v23 }
 0x19d   :  { %v129_v56 = vpop.permute.xlu2 %128 }
 0x19e   :  { %v133_v59 = vperm.slane %v129_v56, %v67_v18 }
 0x1a0   :  { %v135_v60 = vadd.f32 %v133_v59, %v124_v57  ;;  %v136_v61 = vadd.f32 %v133_v59, %v125_v58 }
 0x1a2   :  { %137 = vst [vmem:[#allocation5] sm:$0xff] %v135_v60 }
 0x1a3   :  { %138 = vst [vmem:[#allocation5 + $0x8] sm:$0xff] %v136_v61 }
 0x1a4   :  { %154 = dma.vmem_to_hbm [thread:$0]  %s147_s6, 256, %s149_s1, [#allocation4], %s232_s23, %s232_s23, %s233_s24  }
 0x1a5   :  { %229 = dma.done.wait [#allocation4], 256  }
 0x1a6   :  { %230 = vsyncadd [#allocation4], 4294967040 }
 0x1a7   :  { %167 = vsyncpa [#allocation3], 1 }
 0x1a8   :  { %168 = vsyncpa [#allocation4], 1 }

</bundles_post_ra>
